<compile_context>
chip_gen: v7x
topology: tpu7x:2x2x1
jax: 0.10.0
libtpu: 0.0.40
codegen_flags: <defaults>
</compile_context>

<pallas_src>
import functools

import jax
import jax.numpy as jnp
from jax.experimental import pallas as pl
from jax.experimental.pallas import tpu as pltpu

IN_FEATURES = 16 * 16     # 256
HIDDEN = 64
HIDDEN_PAD = 128          # lane-dense hidden dim (zero-padded)
OUT_FEATURES = 10
OUT_PAD = 128             # lane-dense output dim (zero-padded)


def _round_up(x, m):
    return ((x + m - 1) // m) * m


def _mlp_kernel(x_ref, w1_ref, b1_ref, w2_ref, b2_ref, out_ref):
    # x_ref:  (TILE_B, 256)  bf16
    # w1_ref: (256, 128)     bf16   b1_ref: (1, 128) f32
    # w2_ref: (128, 128)     bf16   b2_ref: (1, 128) f32
    # out_ref:(TILE_B, 128)  f32
    x = x_ref[...]
    h = jnp.dot(x, w1_ref[...], preferred_element_type=jnp.float32)  # MXU, f32 acc
    h = jnp.maximum(h + b1_ref[...], 0.0)                            # bias + ReLU in f32
    h = h.astype(jnp.bfloat16)                                        # back to bf16 for MXU
    o = jnp.dot(h, w2_ref[...], preferred_element_type=jnp.float32) + b2_ref[...]
    out_ref[...] = o.astype(out_ref.dtype)


@functools.partial(jax.jit, static_argnames=("tile_b",))
def mlp_forward(x_nchw, w1_t, b1, w2_t, b2, *, tile_b=1024):
    """x_nchw: (B, C, H, W) with C*H*W == 256. Returns (B, 10) float32.

    w1_t: (256, 64), b1: (64,), w2_t: (64, 10), b2: (10,)   (transposed PyTorch layout)
    """
    B = x_nchw.shape[0]
    x_flat = x_nchw.reshape(B, -1)
    assert x_flat.shape[1] == IN_FEATURES

    # --- batch padding: tile must be a multiple of 16 rows (bf16 sublane packing) ---
    tile_b_eff = min(tile_b, _round_up(B, 16))
    b_pad = _round_up(B, tile_b_eff)
    grid = (b_pad // tile_b_eff,)

    x_b = jnp.zeros((b_pad, IN_FEATURES), jnp.bfloat16).at[:B].set(
        x_flat.astype(jnp.bfloat16))

    # --- lane-dense (zero-padded) weights / biases ---
    w1_p = jnp.zeros((IN_FEATURES, HIDDEN_PAD), jnp.bfloat16).at[:, :HIDDEN].set(
        w1_t.astype(jnp.bfloat16))
    b1_p = jnp.zeros((1, HIDDEN_PAD), jnp.float32).at[:, :HIDDEN].set(
        b1.reshape(1, HIDDEN).astype(jnp.float32))
    w2_p = jnp.zeros((HIDDEN_PAD, OUT_PAD), jnp.bfloat16).at[:HIDDEN, :OUT_FEATURES].set(
        w2_t.astype(jnp.bfloat16))
    b2_p = jnp.zeros((1, OUT_PAD), jnp.float32).at[:, :OUT_FEATURES].set(
        b2.reshape(1, OUT_FEATURES).astype(jnp.float32))

    flops = 2 * b_pad * (IN_FEATURES * HIDDEN_PAD + HIDDEN_PAD * OUT_PAD)
    bytes_accessed = (
        b_pad * IN_FEATURES * 2                       # x (bf16)
        + IN_FEATURES * HIDDEN_PAD * 2                # w1
        + HIDDEN_PAD * OUT_PAD * 2                    # w2
        + (HIDDEN_PAD + OUT_PAD) * 4                  # biases
        + b_pad * OUT_PAD * 4                         # output (f32)
    )

    out_padded = pl.pallas_call(
        _mlp_kernel,
        out_shape=jax.ShapeDtypeStruct((b_pad, OUT_PAD), jnp.float32),
        grid_spec=pltpu.PrefetchScalarGridSpec(
            num_scalar_prefetch=0,
            grid=grid,
            in_specs=[
                pl.BlockSpec((tile_b_eff, IN_FEATURES), lambda i: (i, 0)),   # x tiles
                pl.BlockSpec((IN_FEATURES, HIDDEN_PAD), lambda i: (0, 0)),   # w1 resident
                pl.BlockSpec((1, HIDDEN_PAD), lambda i: (0, 0)),             # b1 resident
                pl.BlockSpec((HIDDEN_PAD, OUT_PAD), lambda i: (0, 0)),       # w2 resident
                pl.BlockSpec((1, OUT_PAD), lambda i: (0, 0)),                # b2 resident
            ],
            out_specs=pl.BlockSpec((tile_b_eff, OUT_PAD), lambda i: (i, 0)),
        ),
        compiler_params=pltpu.CompilerParams(
            dimension_semantics=("parallel",),
            vmem_limit_bytes=64 << 20,
        ),
        cost_estimate=pl.CostEstimate(
            flops=flops, transcendentals=0, bytes_accessed=bytes_accessed),
    )(x_b, w1_p, b1_p, w2_p, b2_p)

    return out_padded[:B, :OUT_FEATURES]


def init_params(key):
    """Deterministic init matching nn.Linear shapes (Kaiming-uniform-like bounds)."""
    k1, k2, k3, k4 = jax.random.split(key, 4)
    bound1 = 1.0 / jnp.sqrt(IN_FEATURES)
    bound2 = 1.0 / jnp.sqrt(HIDDEN)
    # PyTorch Linear weight is (out, in); we store the transpose (in, out) for the kernel.
    w1_t = jax.random.uniform(k1, (IN_FEATURES, HIDDEN), jnp.float32, -bound1, bound1)
    b1 = jax.random.uniform(k2, (HIDDEN,), jnp.float32, -bound1, bound1)
    w2_t = jax.random.uniform(k3, (HIDDEN, OUT_FEATURES), jnp.float32, -bound2, bound2)
    b2 = jax.random.uniform(k4, (OUT_FEATURES,), jnp.float32, -bound2, bound2)
    return w1_t, b1, w2_t, b2


if __name__ == "__main__":
    key = jax.random.PRNGKey(0)
    k_x, k_p = jax.random.split(key)

    # Small example input consistent with the forward pass: (B=2, C=1, H=16, W=16) NCHW.
    x = jax.random.normal(k_x, (2, 1, 16, 16), dtype=jnp.float32)
    w1_t, b1, w2_t, b2 = init_params(k_p)

    out = mlp_forward(x, w1_t, b1, w2_t, b2)
    out = jax.block_until_ready(out)
    assert out.shape == (2, OUT_FEATURES)

    # Reference using the same bf16 matmul operands / f32 accumulation as the kernel.
    x_flat = x.reshape(x.shape[0], -1)
    h_ref = jnp.maximum(
        jnp.dot(x_flat.astype(jnp.bfloat16), w1_t.astype(jnp.bfloat16),
                preferred_element_type=jnp.float32) + b1, 0.0)
    ref = jnp.dot(h_ref.astype(jnp.bfloat16), w2_t.astype(jnp.bfloat16),
                  preferred_element_type=jnp.float32) + b2
    assert jnp.allclose(out, ref, atol=1e-2, rtol=1e-2)

    # Loose sanity check against a pure f32 reference (bf16 rounding tolerance).
    ref_f32 = jnp.maximum(x_flat @ w1_t + b1, 0.0) @ w2_t + b2
    assert jnp.allclose(out, ref_f32, atol=5e-2, rtol=5e-2)

    print("KERNEL_OK")
</pallas_src>

<mosaic_0001>
module attributes {stable_mosaic.version = 11 : i64} {
  func.func @_mlp_kernel(%arg0: i32, %arg1: memref<16x256xbf16, #tpu.memory_space<vmem>>, %arg2: memref<256x128xbf16, #tpu.memory_space<vmem>>, %arg3: memref<1x128xf32, #tpu.memory_space<vmem>>, %arg4: memref<128x128xbf16, #tpu.memory_space<vmem>>, %arg5: memref<1x128xf32, #tpu.memory_space<vmem>>, %arg6: memref<16x128xf32, #tpu.memory_space<vmem>>) attributes {dimension_semantics = [#tpu.dimension_semantics<parallel>], iteration_bounds = array<i64: 1>, scalar_prefetch = 0 : i64, scratch_operands = 0 : i64, tpu.core_type = #tpu.core_type<tc>, window_params = [{transform_indices = @transform_0, window_bounds = array<i64: 16, 256>}, {pipeline_mode = #tpu.pipeline_mode<synchronous>, transform_indices = @transform_1, window_bounds = array<i64: 256, 128>}, {pipeline_mode = #tpu.pipeline_mode<synchronous>, transform_indices = @transform_2, window_bounds = array<i64: 1, 128>}, {pipeline_mode = #tpu.pipeline_mode<synchronous>, transform_indices = @transform_3, window_bounds = array<i64: 128, 128>}, {pipeline_mode = #tpu.pipeline_mode<synchronous>, transform_indices = @transform_4, window_bounds = array<i64: 1, 128>}, {transform_indices = @transform_5, window_bounds = array<i64: 16, 128>}]} {
    %c0 = arith.constant 0 : index
    %c0_0 = arith.constant 0 : index
    %0 = vector.load %arg1[%c0, %c0_0] : memref<16x256xbf16, #tpu.memory_space<vmem>>, vector<16x256xbf16>
    %c0_1 = arith.constant 0 : index
    %c0_2 = arith.constant 0 : index
    %1 = vector.load %arg2[%c0_1, %c0_2] : memref<256x128xbf16, #tpu.memory_space<vmem>>, vector<256x128xbf16>
    %cst = arith.constant dense<0.000000e+00> : vector<16x128xf32>
    %2 = tpu.matmul %0, %1, %cst {dimension_numbers = #tpu.dot_dimension_numbers<[1], [0], [0], [1], [0, 0, 1, 1], [], []>} : vector<16x256xbf16>, vector<256x128xbf16>, vector<16x128xf32> -> vector<16x128xf32>
    %c0_3 = arith.constant 0 : index
    %c0_4 = arith.constant 0 : index
    %3 = vector.load %arg3[%c0_3, %c0_4] : memref<1x128xf32, #tpu.memory_space<vmem>>, vector<1x128xf32>
    %4 = vector.broadcast %3 : vector<1x128xf32> to vector<16x128xf32>
    %5 = arith.addf %2, %4 : vector<16x128xf32>
    %cst_5 = arith.constant 0.000000e+00 : f32
    %6 = vector.broadcast %cst_5 : f32 to vector<16x128xf32>
    %7 = arith.maximumf %5, %6 : vector<16x128xf32>
    %8 = arith.truncf %7 : vector<16x128xf32> to vector<16x128xbf16>
    %c0_6 = arith.constant 0 : index
    %c0_7 = arith.constant 0 : index
    %9 = vector.load %arg4[%c0_6, %c0_7] : memref<128x128xbf16, #tpu.memory_space<vmem>>, vector<128x128xbf16>
    %cst_8 = arith.constant dense<0.000000e+00> : vector<16x128xf32>
    %10 = tpu.matmul %8, %9, %cst_8 {dimension_numbers = #tpu.dot_dimension_numbers<[1], [0], [0], [1], [0, 0, 1, 1], [], []>} : vector<16x128xbf16>, vector<128x128xbf16>, vector<16x128xf32> -> vector<16x128xf32>
    %c0_9 = arith.constant 0 : index
    %c0_10 = arith.constant 0 : index
    %11 = vector.load %arg5[%c0_9, %c0_10] : memref<1x128xf32, #tpu.memory_space<vmem>>, vector<1x128xf32>
    %12 = vector.broadcast %11 : vector<1x128xf32> to vector<16x128xf32>
    %13 = arith.addf %10, %12 : vector<16x128xf32>
    %c0_11 = arith.constant 0 : index
    %c0_12 = arith.constant 0 : index
    %14 = vector.load %arg6[%c0_11, %c0_12] : memref<16x128xf32, #tpu.memory_space<vmem>>, vector<16x128xf32>
    tpu.vector_store %arg6[%c0_11, %c0_12], %13 {strides = array<i32>} : memref<16x128xf32, #tpu.memory_space<vmem>>, vector<16x128xf32>,
    return
  }
  func.func @transform_0(%arg0: i32) -> (i32, i32) {
    %c0_i32 = arith.constant 0 : i32
    %c0_i32_0 = arith.constant 0 : i32
    return %arg0, %c0_i32 : i32, i32
  }
  func.func @transform_1(%arg0: i32) -> (i32, i32) {
    %c0_i32 = arith.constant 0 : i32
    %c0_i32_0 = arith.constant 0 : i32
    %c0_i32_1 = arith.constant 0 : i32
    return %c0_i32, %c0_i32_0 : i32, i32
  }
  func.func @transform_2(%arg0: i32) -> (i32, i32) {
    %c0_i32 = arith.constant 0 : i32
    %c0_i32_0 = arith.constant 0 : i32
    %c0_i32_1 = arith.constant 0 : i32
    return %c0_i32, %c0_i32_0 : i32, i32
  }
  func.func @transform_3(%arg0: i32) -> (i32, i32) {
    %c0_i32 = arith.constant 0 : i32
    %c0_i32_0 = arith.constant 0 : i32
    %c0_i32_1 = arith.constant 0 : i32
    return %c0_i32, %c0_i32_0 : i32, i32
  }
  func.func @transform_4(%arg0: i32) -> (i32, i32) {
    %c0_i32 = arith.constant 0 : i32
    %c0_i32_0 = arith.constant 0 : i32
    %c0_i32_1 = arith.constant 0 : i32
    return %c0_i32, %c0_i32_0 : i32, i32
  }
  func.func @transform_5(%arg0: i32) -> (i32, i32) {
    %c0_i32 = arith.constant 0 : i32
    %c0_i32_0 = arith.constant 0 : i32
    return %arg0, %c0_i32 : i32, i32
  }
}

</mosaic_0001>

<bundles_post_ra>
// kernel: mlp_forward.1
= control target key start
LH: loop header
LB: loop body
LE: loop exit
PB: predicated region body
PF: predicated region fallthrough
CT: control target
= control target key end

     0   :  { %10 = vsyncpa [#allocation3], 0  ;;  %s788_s0 = inlined_call_operand.hbm [shape: bf16[16,256], index: 0, kind: input, shape index: {}]   ;;  %s789_s1 = inlined_call_operand.hbm [shape: bf16[256,128], index: 1, kind: input, shape index: {}]   ;;  %s790_s2 = inlined_call_operand.hbm [shape: f32[1,128], index: 2, kind: input, shape index: {}]   ;;  %s791_s3 = inlined_call_operand.hbm [shape: bf16[128,128], index: 3, kind: input, shape index: {}]   ;;  %s792_s4 = inlined_call_operand.hbm [shape: f32[1,128], index: 4, kind: input, shape index: {}]   ;;  %s793_s5 = inlined_call_operand.hbm [shape: f32[16,128], index: 5, kind: output, shape index: {}]  }
   0x1   :  { %11 = vsyncpa [#allocation6], 0 }
   0x2   :  { %12 = vsyncpa [#allocation9], 0 }
   0x3   :  { %13 = vsyncpa [#allocation4], 0  ;;  %s668_s18 = smov [#allocation5]   ;;  %s528_s22 = scalar_lea.hbm %s789_s1, 2048 }
   0x4   :  { %s31_s19 = sshll.u32 %s668_s18, 4  ;;  %p529_p0 = scmp.ne.s32.totalorder %s789_s1, %s528_s22  ;;  %s32_s19 = int_to_ptr.vmem [resolvable:$true] %s31_s19 }
   0x5   :  { %p532_p1 = scmp.lt.u32.totalorder %s528_s22, %s789_s1 }
   0x7   :  { %p534_p2 = pnand %p532_p1, %p529_p0 }
   0x9   :  { %537 = shalt.err (!%p534_p2)
}
   0xa   :  { %s538_s27 = scalar_lea.vmem %s32_s19, 2048  ;;  %p543_p4 = scmp.lt.s32.totalorder %s32_s19, %s32_s19 }
   0xb   :  { %p539_p3 = scmp.ne.s32.totalorder %s32_s19, %s538_s27  ;;  %p544_p5 = scmp.lt.s32.totalorder %s538_s27, %s538_s27 }
   0xd   :  { %p545_p6 = por %p544_p5, %p543_p4 }
   0xf   :  { %p546_p7 = pnand %p545_p6, %p539_p3 }
  0x11   :  { %549 = shalt.err (!%p546_p7)
}
  0x12   :  { %s669_s28 = smov 64   ;;  %s670_s29 = smov 4  }
  0x13   :  { %37 = dma.hbm_to_vmem [thread:$0]  %s789_s1, 2048, %s32_s19, [#allocation6], %s669_s28, %s669_s28, %s670_s29  }
  0x14   :  { %s671_s7 = smov [#allocation8]   ;;  %s672_s9 = smov [#allocation2]  }
  0x15   :  { %s53_s8 = sshll.u32 %s671_s7, 4  ;;  %s19_s10 = sshll.u32 %s672_s9, 4  ;;  %s54_s8 = int_to_ptr.vmem [resolvable:$true] %s53_s8  ;;  %s20_s10 = int_to_ptr.vmem [resolvable:$true] %s19_s10 }
  0x16   :  { %s550_s13 = scalar_lea.hbm %s791_s3, 1024 }
  0x17   :  { %p551_p8 = scmp.ne.s32.totalorder %s791_s3, %s550_s13  ;;  %p554_p9 = scmp.lt.u32.totalorder %s550_s13, %s791_s3 }
  0x19   :  { %p556_p10 = pnand %p554_p9, %p551_p8 }
  0x1b   :  { %559 = shalt.err (!%p556_p10)
}
  0x1c   :  { %s560_s1 = scalar_lea.vmem %s54_s8, 1024  ;;  %p565_p12 = scmp.lt.s32.totalorder %s54_s8, %s54_s8 }
  0x1d   :  { %p561_p11 = scmp.ne.s32.totalorder %s54_s8, %s560_s1  ;;  %p566_p13 = scmp.lt.s32.totalorder %s560_s1, %s560_s1 }
  0x1f   :  { %p567_p0 = por %p566_p13, %p565_p12 }
  0x21   :  { %p568_p1 = pnand %p567_p0, %p561_p11 }
  0x23   :  { %571 = shalt.err (!%p568_p1)
}
  0x24   :  { %59 = dma.hbm_to_vmem [thread:$0]  %s791_s3, 1024, %s54_s8, [#allocation9], %s669_s28, %s669_s28, %s670_s29  }
  0x25   :  { %s572_s22 = scalar_lea.hbm %s788_s0, 256 }
  0x26   :  { %p573_p2 = scmp.ne.s32.totalorder %s788_s0, %s572_s22  ;;  %p576_p3 = scmp.lt.u32.totalorder %s572_s22, %s788_s0 }
  0x28   :  { %p578_p4 = pnand %p576_p3, %p573_p2 }
  0x2a   :  { %581 = shalt.err (!%p578_p4)
}
  0x2b   :  { %s582_s27 = scalar_lea.vmem %s20_s10, 256  ;;  %p587_p6 = scmp.lt.s32.totalorder %s20_s10, %s20_s10 }
  0x2c   :  { %p583_p5 = scmp.ne.s32.totalorder %s20_s10, %s582_s27  ;;  %p588_p7 = scmp.lt.s32.totalorder %s582_s27, %s582_s27 }
  0x2e   :  { %p589_p8 = por %p588_p7, %p587_p6 }
  0x30   :  { %p590_p9 = pnand %p589_p8, %p583_p5 }
  0x32   :  { %593 = shalt.err (!%p590_p9)
}
  0x33   :  { %s673_s3 = smov 128   ;;  %s674_s28 = smov 8  }
  0x34   :  { %25 = dma.hbm_to_vmem [thread:$0]  %s788_s0, 256, %s20_s10, [#allocation3], %s673_s3, %s673_s3, %s674_s28  }
  0x35   :  { %s675_s6 = smov [#allocation7]   ;;  %s676_s8 = smov [#allocation10]  }
  0x36   :  { %s44_s7 = sshll.u32 %s675_s6, 4  ;;  %s66_s9 = sshll.u32 %s676_s8, 4  ;;  %s45_s7 = int_to_ptr.vmem [resolvable:$true] %s44_s7  ;;  %s67_s9 = int_to_ptr.vmem [resolvable:$true] %s66_s9 }
  0x37   :  { %s594_s13 = scalar_lea.hbm %s790_s2, 16 }
  0x38   :  { %p595_p10 = scmp.ne.s32.totalorder %s790_s2, %s594_s13  ;;  %p598_p11 = scmp.lt.u32.totalorder %s594_s13, %s790_s2 }
  0x3a   :  { %p600_p12 = pnand %p598_p11, %p595_p10 }
  0x3c   :  { %603 = shalt.err (!%p600_p12)
}
  0x3d   :  { %s604_s0 = scalar_lea.vmem %s45_s7, 16  ;;  %s608_s10 = scalar_lea.vmem %s45_s7, 32 }
  0x3e   :  { %p605_p13 = scmp.ne.s32.totalorder %s45_s7, %s604_s0  ;;  %p609_p0 = scmp.lt.s32.totalorder %s45_s7, %s45_s7 }
  0x3f   :  { %p610_p1 = scmp.lt.s32.totalorder %s608_s10, %s604_s0 }
  0x41   :  { %p611_p2 = por %p610_p1, %p609_p0 }
  0x43   :  { %p612_p3 = pnand %p611_p2, %p605_p13 }
  0x45   :  { %615 = shalt.err (!%p612_p3)
}
  0x46   :  { %47 = dma.hbm_to_vmem [thread:$0]  %s790_s2, 16, %s45_s7, [#allocation6]  }
  0x47   :  { %s616_s21 = scalar_lea.hbm %s792_s4, 16 }
  0x48   :  { %p617_p4 = scmp.ne.s32.totalorder %s792_s4, %s616_s21  ;;  %p620_p5 = scmp.lt.u32.totalorder %s616_s21, %s792_s4 }
  0x4a   :  { %p622_p6 = pnand %p620_p5, %p617_p4 }
  0x4c   :  { %625 = shalt.err (!%p622_p6)
}
  0x4d   :  { %s626_s26 = scalar_lea.vmem %s67_s9, 16  ;;  %s630_s27 = scalar_lea.vmem %s67_s9, 32 }
  0x4e   :  { %p627_p7 = scmp.ne.s32.totalorder %s67_s9, %s626_s26  ;;  %p631_p8 = scmp.lt.s32.totalorder %s67_s9, %s67_s9 }
  0x4f   :  { %p632_p9 = scmp.lt.s32.totalorder %s630_s27, %s626_s26 }
  0x51   :  { %p633_p10 = por %p632_p9, %p631_p8 }
  0x53   :  { %p634_p11 = pnand %p633_p10, %p627_p7 }
  0x55   :  { %637 = shalt.err (!%p634_p11)
}
  0x56   :  { %69 = dma.hbm_to_vmem [thread:$0]  %s792_s4, 16, %s67_s9, [#allocation9]  }
  0x57   :  { %660 = dma.done.wait [#allocation3], 256  }
  0x58   :  { %661 = vsyncadd [#allocation3], 4294967040 }
  0x59   :  { %662 = dma.done.wait [#allocation6], 2064  }
  0x5a   :  { %663 = vsyncadd [#allocation6], 4294965232 }
  0x5b   :  { %664 = dma.done.wait [#allocation9], 1040  }
  0x5c   :  { %665 = vsyncadd [#allocation9], 4294966256  ;;  %v677_v0 = vmov 0.0   ;;  %v501_v1 = vld [vmem:[#allocation5 + $0x40] sm:$0xff]   ;;  %v503_v3 = vld [vmem:[#allocation5 + $0x48] sm:$0xff]   ;;  %vm678_vm0 = vmmov 0  }
  0x5d   :  { %469 = vmatprep.subr.bf16.mxu1 %v677_v0  ;;  %v502_v2 = vld [vmem:[#allocation5] sm:$0xff]   ;;  %438 = vmatprep.subr.bf16.mxu0 %v501_v1  ;;  %v504_v4 = vld [vmem:[#allocation5 + $0x8] sm:$0xff]   ;;  %v505_v5 = vld [vmem:[#allocation5 + $0x50] sm:$0xff]   ;;  %s679_s4 = smov [#allocation11]  }
  0x5e   :  { %439 = vmatpush3.bf16.msra.mxu0 %v502_v2  ;;  %v506_v6 = vld [vmem:[#allocation5 + $0x10] sm:$0xff]   ;;  %v507_v7 = vld [vmem:[#allocation5 + $0x58] sm:$0xff]   ;;  %v509_v9 = vld [vmem:[#allocation5 + $0x60] sm:$0xff]   ;;  %485 = vmatprep.mubr.msk.bf16.mxu1 %vm678_vm0, %v677_v0  ;;  %s396_s30 = sshll.u32 %s679_s4, 4  ;;  %s397_s30 = int_to_ptr.vmem [resolvable:$true] %s396_s30 }
  0x5f   :  { %440 = vmatprep.subr.bf16.mxu0 %v503_v3  ;;  %v508_v8 = vld [vmem:[#allocation5 + $0x18] sm:$0xff]   ;;  %v510_v10 = vld [vmem:[#allocation5 + $0x20] sm:$0xff]   ;;  %v511_v11 = vld [vmem:[#allocation5 + $0x68] sm:$0xff]   ;;  %s638_s6 = scalar_lea.vmem %s397_s30, 256  ;;  %p643_p13 = scmp.lt.s32.totalorder %s397_s30, %s397_s30 }
  0x60   :  { %v512_v12 = vld [vmem:[#allocation5 + $0x28] sm:$0xff]   ;;  %v519_v13 = vld [vmem:[#allocation2 + $0x4] ss:$8 sps:$4 sm:$0xff]   ;;  %v517_v22 = vld [vmem:[#allocation2] ss:$8 sps:$4 sm:$0xff]   ;;  %p639_p12 = scmp.ne.s32.totalorder %s397_s30, %s638_s6  ;;  %p644_p0 = scmp.lt.s32.totalorder %s638_s6, %s638_s6 }
  0x61   :  { %v520_v14 = vld [vmem:[#allocation8] sm:$0xff]   ;;  %v513_v15 = vld [vmem:[#allocation5 + $0x70] sm:$0xff]   ;;  %265 = vmatprep.mubr.bf16.mxu0 %v519_v13  ;;  %v515_v18 = vld [vmem:[#allocation5 + $0x78] sm:$0xff]  }
  0x62   :  { %441 = vmatpush3.bf16.msra.mxu0 %v504_v4  ;;  %470 = vmatpush3.bf16.msra.mxu1 %v520_v14  ;;  %v521_v16 = vld [vmem:[#allocation8 + $0x8] sm:$0xff]   ;;  %v522_v19 = vld [vmem:[#allocation8 + $0x10] sm:$0xff]   ;;  %v523_v21 = vld [vmem:[#allocation8 + $0x18] sm:$0xff]   ;;  %p645_p1 = por %p644_p0, %p643_p13 }
  0x63   :  { %442 = vmatprep.subr.bf16.mxu0 %v505_v5  ;;  %471 = vmatprep.subr.bf16.mxu1 %v677_v0  ;;  %v514_v17 = vld [vmem:[#allocation5 + $0x30] sm:$0xff]   ;;  %v516_v20 = vld [vmem:[#allocation5 + $0x38] sm:$0xff]   ;;  %v524_v23 = vld [vmem:[#allocation8 + $0x20] sm:$0xff]  }
  0x64   :  { %v525_v24 = vld [vmem:[#allocation8 + $0x28] sm:$0xff]   ;;  %v526_v25 = vld [vmem:[#allocation8 + $0x30] sm:$0xff]   ;;  %v527_v26 = vld [vmem:[#allocation8 + $0x38] sm:$0xff]   ;;  %p646_p2 = pnand %p645_p1, %p639_p12 }
  0x65   :  { %v410_v28 = vld [vmem:[#allocation7] ss:$0 sm:$0xff]  ;;  %v429_v39 = vld [vmem:[#allocation10] ss:$0 sm:$0xff] }
  0x66   :  { %443 = vmatpush3.bf16.msra.mxu0 %v506_v6  ;;  %472 = vmatpush3.bf16.msra.mxu1 %v521_v16 }
  0x67   :  { %444 = vmatprep.subr.bf16.mxu0 %v507_v7  ;;  %473 = vmatprep.subr.bf16.mxu1 %v677_v0 }
  0x6a   :  { %445 = vmatpush3.bf16.msra.mxu0 %v508_v8  ;;  %474 = vmatpush3.bf16.msra.mxu1 %v522_v19 }
  0x6b   :  { %446 = vmatprep.subr.bf16.mxu0 %v509_v9  ;;  %475 = vmatprep.subr.bf16.mxu1 %v677_v0 }
  0x6e   :  { %447 = vmatpush3.bf16.msra.mxu0 %v510_v10  ;;  %476 = vmatpush3.bf16.msra.mxu1 %v523_v21 }
  0x6f   :  { %448 = vmatprep.subr.bf16.mxu0 %v511_v11  ;;  %477 = vmatprep.subr.bf16.mxu1 %v677_v0 }
  0x72   :  { %449 = vmatpush3.bf16.msra.mxu0 %v512_v12  ;;  %478 = vmatpush3.bf16.msra.mxu1 %v524_v23 }
  0x73   :  { %450 = vmatprep.subr.bf16.mxu0 %v513_v15  ;;  %479 = vmatprep.subr.bf16.mxu1 %v677_v0 }
  0x76   :  { %451 = vmatpush3.bf16.msra.mxu0 %v514_v17  ;;  %480 = vmatpush3.bf16.msra.mxu1 %v525_v24 }
  0x77   :  { %452 = vmatprep.subr.bf16.mxu0 %v515_v18  ;;  %481 = vmatprep.subr.bf16.mxu1 %v677_v0 }
  0x7a   :  { %453 = vmatpush3.bf16.msra.mxu0 %v516_v20  ;;  %482 = vmatpush3.bf16.msra.mxu1 %v526_v25 }
  0x7b   :  { %483 = vmatprep.subr.bf16.mxu1 %v677_v0 }
  0x7d   :  { %266 = vmatmul.mubr.bf16.vlgmr.msra.gmra.mrb[0].mxu0 %v517_v22 }
  0x7e   :  { %484 = vmatpush3.bf16.msra.mxu1 %v527_v26 }
 0x150   :  { %v454_v27 = vpop.f32.mrb[0].mxu0 }
 0x151   :  { %v455_v29 = vpop.f32.mrb[1].mxu0 }
 0x152   :  { %v456_v30 = vadd.f32 %v455_v29, %v454_v27  ;;  %v457_v31 = vpop.f32.mrb[2].mxu0 }
 0x153   :  { %v458_v32 = vpop.f32.mrb[3].mxu0 }
 0x154   :  { %v268_v33 = vadd.f32 %v456_v30, %v410_v28  ;;  %v459_v34 = vadd.f32 %v458_v32, %v457_v31 }
 0x156   :  { %v271_v35 = vadd.f32 %v459_v34, %v410_v28  ;;  %v274_v36 = vmax.f32 %v268_v33, 0.0 }
 0x158   :  { %v275_v37 = vmax.f32 %v271_v35, 0.0 }
 0x15a   :  { %v276_v38 = vpack.c.bf16 %v275_v37, %v274_v36 }
 0x15c   :  { %486 = vmatmul.mubr.bf16.vlgmr.msra.gmra.mrb[0].mxu1 %v276_v38 }
 0x22f   :  { %v382_v40 = vpop.f32.mrb[0].mxu1 }
 0x230   :  { %v383_v41 = vadd.f32 %v429_v39, %v382_v40  ;;  %v487_v42 = vpop.f32.mrb[1].mxu1 }
 0x231   :  { %v385_v43 = vpop.f32.mrb[2].mxu1 }
 0x232   :  { %389 = vst [vmem:[#allocation11] sm:$0xff] %v383_v41  ;;  %v386_v44 = vadd.f32 %v429_v39, %v385_v43  ;;  %v488_v45 = vpop.f32.mrb[3].mxu1 }
 0x234   :  { %390 = vst [vmem:[#allocation11 + $0x8] sm:$0xff] %v386_v44 }
 0x235   :  { %649 = shalt.err (!%p646_p2)
}
 0x236   :  { %s650_s9 = scalar_lea.hbm %s793_s5, 256 }
 0x237   :  { %p651_p3 = scmp.ne.s32.totalorder %s793_s5, %s650_s9  ;;  %p654_p4 = scmp.lt.u32.totalorder %s650_s9, %s793_s5 }
 0x239   :  { %p656_p5 = pnand %p654_p4, %p651_p3 }
 0x23b   :  { %659 = shalt.err (!%p656_p5)
}
 0x23c   :  { %402 = dma.vmem_to_hbm [thread:$0]  %s397_s30, 256, %s793_s5, [#allocation4], %s673_s3, %s673_s3, %s674_s28  }
 0x23d   :  { %666 = dma.done.wait [#allocation4], 256  }
 0x23e   :  { %667 = vsyncadd [#allocation4], 4294967040 }
 0x23f   :  { %406 = vsyncpa [#allocation3], 1 }
 0x240   :  { %407 = vsyncpa [#allocation6], 1 }
 0x241   :  { %408 = vsyncpa [#allocation9], 1 }
 0x242   :  { %409 = vsyncpa [#allocation4], 1 }

</bundles_post_ra>
